<compile_context>
chip_gen: v5e
topology: v5e:2x2
jax: 0.10.0
libtpu: 0.0.40
codegen_flags: <defaults>
</compile_context>

<pallas_src>
import math

import jax
import jax.numpy as jnp
from jax.experimental import pallas as pl
from jax.experimental.pallas import tpu as pltpu

_INV_SQRT2 = 1.0 / math.sqrt(2.0)


# --------------------------------------------------------------------------------------
# Kernels
# --------------------------------------------------------------------------------------
def _gelu_exact_f32(h):
    # Exact (erf-based) GELU in f32, matching torch.nn.GELU() default.
    return 0.5 * h * (1.0 + jax.lax.erf(h * _INV_SQRT2))


def _mlp_kernel_accum_out(x_ref, w1_ref, b1_ref, w2t_ref, b2_ref, o_ref):
    """f32-output path: accumulate directly into the resident output block (no scratch)."""
    j = pl.program_id(1)

    @pl.when(j == 0)
    def _init():
        o_ref[...] = jnp.zeros_like(o_ref)

    # h_j = x @ W1[j]^T + b1[j]     x: [TM, D], W1[j]: [TN, D] -> [TM, TN] f32
    h = jax.lax.dot_general(
        x_ref[...], w1_ref[...],
        dimension_numbers=(((1,), (1,)), ((), ())),
        preferred_element_type=jnp.float32,
    ) + b1_ref[...]
    h = _gelu_exact_f32(h)

    # o += gelu(h_j) @ W2T[j]       W2T[j]: [TN, D] -> plain A.B contraction
    o_ref[...] += jnp.dot(h.astype(w2t_ref.dtype), w2t_ref[...],
                          preferred_element_type=jnp.float32)

    @pl.when(j == pl.num_programs(1) - 1)
    def _finalize():
        # Bias 2 added exactly once; dropout (eval mode) == identity.
        o_ref[...] += b2_ref[...]


def _mlp_kernel_scratch(x_ref, w1_ref, b1_ref, w2t_ref, b2_ref, o_ref, acc_ref):
    """Non-f32-output path: f32 accumulator scratch, cast once at finalize."""
    j = pl.program_id(1)

    @pl.when(j == 0)
    def _init():
        acc_ref[...] = jnp.zeros_like(acc_ref)

    h = jax.lax.dot_general(
        x_ref[...], w1_ref[...],
        dimension_numbers=(((1,), (1,)), ((), ())),
        preferred_element_type=jnp.float32,
    ) + b1_ref[...]
    h = _gelu_exact_f32(h)

    acc_ref[...] += jnp.dot(h.astype(w2t_ref.dtype), w2t_ref[...],
                            preferred_element_type=jnp.float32)

    @pl.when(j == pl.num_programs(1) - 1)
    def _finalize():
        o_ref[...] = (acc_ref[...] + b2_ref[...]).astype(o_ref.dtype)


# --------------------------------------------------------------------------------------
# Hardware-aware configuration
# --------------------------------------------------------------------------------------
_MiB = 1024 * 1024


def _hw_config():
    """TPU-generation-specific tile sizes and scoped-VMEM limit."""
    try:
        kind = jax.devices()[0].device_kind.lower()
    except Exception:  # pragma: no cover - defensive
        kind = ""
    if "v7" in kind or "7x" in kind:
        # 64 MiB physical VMEM per TC; 2 TCs -> keep the row axis splittable.
        return dict(block_m=512, block_n=512, vmem_limit=56 * _MiB, two_cores=True)
    if "v6" in kind:
        # 128 MiB VMEM, ~650 flops/byte roofline balance -> big row tiles.
        return dict(block_m=1024, block_n=1024, vmem_limit=100 * _MiB, two_cores=False)
    if "v5 lite" in kind or "v5e" in kind or "v5litepod" in kind:
        # ~240 flops/byte balance: TM=256 already compute-bound, but 16 MiB default
        # scoped VMEM must be raised explicitly.
        return dict(block_m=256, block_n=512, vmem_limit=100 * _MiB, two_cores=False)
    # Unknown generation: conservative tiles, conservative limit.
    return dict(block_m=256, block_n=512, vmem_limit=64 * _MiB, two_cores=False)


def _pick_tile(total, preferred, candidates):
    """Largest of (preferred, *candidates) that evenly divides `total`; else full extent."""
    for c in (preferred,) + tuple(candidates):
        if c <= total and total % c == 0:
            return c
    return total


# --------------------------------------------------------------------------------------
# Host-side parameter preparation (do ONCE, outside the per-step call)
# --------------------------------------------------------------------------------------
def prepare_mlp_params(w1, b1, w2, b2, *, compute_dtype=jnp.bfloat16):
    """Cast weights to the MXU dtype and pre-transpose W2 once.

    torch.nn.Linear layouts: w1 [inter, dim], b1 [inter], w2 [dim, inter], b2 [dim].
    Returns (w1_c [inter, dim], b1_2d [1, inter] f32, w2t_c [inter, dim], b2_2d [1, dim] f32).
    """
    w1c = w1.astype(compute_dtype)                       # [inter, dim] (A.Bt is MXU native)
    w2t = jnp.transpose(w2).astype(compute_dtype)        # [inter, dim] -> plain A.B in kernel
    b1_2d = b1.reshape(1, -1).astype(jnp.float32)
    b2_2d = b2.reshape(1, -1).astype(jnp.float32)
    return w1c, b1_2d, w2t, b2_2d


# --------------------------------------------------------------------------------------
# Forward
# --------------------------------------------------------------------------------------
def mlp_forward(x, w1c, b1_2d, w2t, b2_2d, *,
                block_m=None, block_n=None, vmem_limit_bytes=None):
    """x: [batch, seq, dim]. Weights must come from prepare_mlp_params (pre-cast once)."""
    batch, seq, dim = x.shape
    inter = w1c.shape[0]
    rows = batch * seq

    cfg = _hw_config()
    block_m = cfg["block_m"] if block_m is None else block_m
    block_n = cfg["block_n"] if block_n is None else block_n
    vmem_limit_bytes = cfg["vmem_limit"] if vmem_limit_bytes is None else vmem_limit_bytes

    op_dtype = w1c.dtype
    out_dtype = x.dtype
    x2d = x.reshape(rows, dim).astype(op_dtype)

    # Pad rows to a multiple of 8 so the accumulator / row tiles never have to be
    # full-extent for ragged row counts.
    pad = (-rows) % 8
    rows_p = rows + pad
    if pad:
        x2d = jnp.pad(x2d, ((0, pad), (0, 0)))

    tm = _pick_tile(rows_p, block_m,
                    (1024, 768, 512, 384, 256, 128, 64, 32, 16, 8))
    tn = _pick_tile(inter, block_n, (1024, 512, 256, 128))  # lane multiples only
    if cfg["two_cores"]:
        # Make sure the megacore-parallel row axis has at least 2 tiles when possible.
        while rows_p // tm < 2 and tm % 16 == 0:
            tm //= 2
    grid = (rows_p // tm, inter // tn)

    itemsize = jnp.dtype(op_dtype).itemsize
    cost = pl.CostEstimate(
        flops=4 * rows_p * dim * inter,                       # two matmuls
        transcendentals=rows_p * inter,                       # erf
        bytes_accessed=int(
            rows_p * dim * itemsize                           # x
            + grid[0] * 2 * inter * dim * itemsize            # weights re-streamed per row tile
            + (inter + dim) * 4                               # biases
            + rows_p * dim * jnp.dtype(out_dtype).itemsize    # output
        ),
    )

    out_is_f32 = jnp.dtype(out_dtype) == jnp.dtype(jnp.float32)
    if out_is_f32:
        kernel = _mlp_kernel_accum_out
        scratch_shapes = []                                   # accumulate into o_ref directly
    else:
        kernel = _mlp_kernel_scratch
        scratch_shapes = [pltpu.VMEM((tm, dim), jnp.float32)]

    out2d = pl.pallas_call(
        kernel,
        out_shape=jax.ShapeDtypeStruct((rows_p, dim), out_dtype),
        grid_spec=pltpu.PrefetchScalarGridSpec(
            num_scalar_prefetch=0,
            grid=grid,
            in_specs=[
                # x row slab: invariant across j -> single buffer (reclaims TM*dim*2 B VMEM).
                pl.BlockSpec((tm, dim), lambda i, j: (i, 0),
                             pipeline_mode=pl.Buffered(buffer_count=1)),
                pl.BlockSpec((tn, dim), lambda i, j: (j, 0)),    # W1 inter tile
                pl.BlockSpec((1, tn), lambda i, j: (0, j)),      # b1 inter tile
                pl.BlockSpec((tn, dim), lambda i, j: (j, 0)),    # W2^T inter tile
                pl.BlockSpec((1, dim), lambda i, j: (0, 0)),     # b2 (resident)
            ],
            out_specs=pl.BlockSpec((tm, dim), lambda i, j: (i, 0)),
            scratch_shapes=scratch_shapes,
        ),
        compiler_params=pltpu.CompilerParams(
            dimension_semantics=("parallel", "arbitrary"),
            vmem_limit_bytes=vmem_limit_bytes,
        ),
        cost_estimate=cost,
    )(x2d, w1c, b1_2d, w2t, b2_2d)

    if pad:
        out2d = out2d[:rows]
    return out2d.reshape(batch, seq, dim)


# --------------------------------------------------------------------------------------
# Reference + demo
# --------------------------------------------------------------------------------------
def _reference(x, w1, b1, w2, b2):
    h = jnp.einsum("bsd,id->bsi", x, w1) + b1
    h = 0.5 * h * (1.0 + jax.lax.erf(h / jnp.sqrt(2.0)))
    y = jnp.einsum("bsi,di->bsd", h, w2) + b2
    return y  # dropout (eval mode) == identity


if __name__ == "__main__":
    dim = 4
    inter = dim * 4
    batch, seq = 2, 8

    key = jax.random.PRNGKey(0)
    kx, k1, k2, k3, k4 = jax.random.split(key, 5)

    x = jax.random.normal(kx, (batch, seq, dim), dtype=jnp.float32)
    # torch.nn.Linear layouts: weight [out, in], bias [out]
    bound1 = 1.0 / math.sqrt(dim)
    w1 = jax.random.uniform(k1, (inter, dim), jnp.float32, -bound1, bound1)
    b1 = jax.random.uniform(k2, (inter,), jnp.float32, -bound1, bound1)
    bound2 = 1.0 / math.sqrt(inter)
    w2 = jax.random.uniform(k3, (dim, inter), jnp.float32, -bound2, bound2)
    b2 = jax.random.uniform(k4, (dim,), jnp.float32, -bound2, bound2)

    # One-time weight prep (cast to bf16 + W2 transpose) — not repeated per forward.
    w1c, b1_2d, w2t, b2_2d = prepare_mlp_params(w1, b1, w2, b2)

    out = mlp_forward(x, w1c, b1_2d, w2t, b2_2d)      # bf16 operands, f32 accumulation
    jax.block_until_ready(out)

    ref = _reference(x, w1, b1, w2, b2)
    assert out.shape == (batch, seq, dim)
    # bf16 matmul operands -> loosened tolerance vs the f32 reference.
    assert jnp.allclose(out, ref, atol=5e-2, rtol=5e-2), (
        f"mismatch vs reference; max abs diff = {jnp.max(jnp.abs(out - ref))}")

    print("KERNEL_OK")
</pallas_src>

<mosaic_0001>
module attributes {stable_mosaic.version = 11 : i64} {
  func.func @_mlp_kernel_accum_out(%arg0: i32, %arg1: i32, %arg2: memref<16x4xbf16, #tpu.memory_space<vmem>>, %arg3: memref<16x4xbf16, #tpu.memory_space<vmem>>, %arg4: memref<1x16xf32, #tpu.memory_space<vmem>>, %arg5: memref<16x4xbf16, #tpu.memory_space<vmem>>, %arg6: memref<1x4xf32, #tpu.memory_space<vmem>>, %arg7: memref<16x4xf32, #tpu.memory_space<vmem>>) attributes {dimension_semantics = [#tpu.dimension_semantics<parallel>, #tpu.dimension_semantics<arbitrary>], iteration_bounds = array<i64: 1, 1>, scalar_prefetch = 0 : i64, scratch_operands = 0 : i64, tpu.core_type = #tpu.core_type<tc>, window_params = [{pipeline_mode = #tpu.pipeline_mode<synchronous>, transform_indices = @transform_0, window_bounds = array<i64: 16, 4>}, {transform_indices = @transform_1, window_bounds = array<i64: 16, 4>}, {transform_indices = @transform_2, window_bounds = array<i64: 1, 16>}, {transform_indices = @transform_3, window_bounds = array<i64: 16, 4>}, {pipeline_mode = #tpu.pipeline_mode<synchronous>, transform_indices = @transform_4, window_bounds = array<i64: 1, 4>}, {transform_indices = @transform_5, window_bounds = array<i64: 16, 4>}]} {
    %c0_i32 = arith.constant 0 : i32
    %0 = arith.cmpi eq, %arg1, %c0_i32 : i32
    %1 = arith.extui %0 : i1 to i32
    %c0_i32_0 = arith.constant 0 : i32
    %2 = arith.cmpi ne, %1, %c0_i32_0 : i32
    scf.if %2 {
      %cst_18 = arith.constant 0.000000e+00 : f32
      %26 = vector.broadcast %cst_18 : f32 to vector<16x4xf32>
      %c0_19 = arith.constant 0 : index
      %c0_20 = arith.constant 0 : index
      %27 = vector.load %arg7[%c0_19, %c0_20] : memref<16x4xf32, #tpu.memory_space<vmem>>, vector<16x4xf32>
      tpu.vector_store %arg7[%c0_19, %c0_20], %26 {strides = array<i32>} : memref<16x4xf32, #tpu.memory_space<vmem>>, vector<16x4xf32>,
    } else {
    }
    %c0 = arith.constant 0 : index
    %c0_1 = arith.constant 0 : index
    %3 = vector.load %arg2[%c0, %c0_1] : memref<16x4xbf16, #tpu.memory_space<vmem>>, vector<16x4xbf16>
    %c0_2 = arith.constant 0 : index
    %c0_3 = arith.constant 0 : index
    %4 = vector.load %arg3[%c0_2, %c0_3] : memref<16x4xbf16, #tpu.memory_space<vmem>>, vector<16x4xbf16>
    %cst = arith.constant dense<0.000000e+00> : vector<16x16xf32>
    %5 = tpu.matmul %3, %4, %cst {dimension_numbers = #tpu.dot_dimension_numbers<[1], [1], [0], [0], [0, 0, 1, 0], [], []>} : vector<16x4xbf16>, vector<16x4xbf16>, vector<16x16xf32> -> vector<16x16xf32>
    %c0_4 = arith.constant 0 : index
    %c0_5 = arith.constant 0 : index
    %6 = vector.load %arg4[%c0_4, %c0_5] : memref<1x16xf32, #tpu.memory_space<vmem>>, vector<1x16xf32>
    %7 = vector.broadcast %6 : vector<1x16xf32> to vector<16x16xf32>
    %8 = arith.addf %5, %7 : vector<16x16xf32>
    %cst_6 = arith.constant 5.000000e-01 : f32
    %9 = vector.broadcast %cst_6 : f32 to vector<16x16xf32>
    %10 = arith.mulf %9, %8 : vector<16x16xf32>
    %cst_7 = arith.constant 0.707106769 : f32
    %11 = vector.broadcast %cst_7 : f32 to vector<16x16xf32>
    %12 = arith.mulf %8, %11 : vector<16x16xf32>
    %13 = math.erf %12 : vector<16x16xf32>
    %cst_8 = arith.constant 1.000000e+00 : f32
    %14 = vector.broadcast %cst_8 : f32 to vector<16x16xf32>
    %15 = arith.addf %14, %13 : vector<16x16xf32>
    %16 = arith.mulf %10, %15 : vector<16x16xf32>
    %c0_9 = arith.constant 0 : index
    %c0_10 = arith.constant 0 : index
    %17 = vector.load %arg7[%c0_9, %c0_10] : memref<16x4xf32, #tpu.memory_space<vmem>>, vector<16x4xf32>
    %18 = arith.truncf %16 : vector<16x16xf32> to vector<16x16xbf16>
    %c0_11 = arith.constant 0 : index
    %c0_12 = arith.constant 0 : index
    %19 = vector.load %arg5[%c0_11, %c0_12] : memref<16x4xbf16, #tpu.memory_space<vmem>>, vector<16x4xbf16>
    %cst_13 = arith.constant dense<0.000000e+00> : vector<16x4xf32>
    %20 = tpu.matmul %18, %19, %cst_13 {dimension_numbers = #tpu.dot_dimension_numbers<[1], [0], [0], [1], [0, 0, 1, 1], [], []>} : vector<16x16xbf16>, vector<16x4xbf16>, vector<16x4xf32> -> vector<16x4xf32>
    %21 = arith.addf %17, %20 : vector<16x4xf32>
    %c0_14 = arith.constant 0 : index
    %c0_15 = arith.constant 0 : index
    %22 = vector.load %arg7[%c0_14, %c0_15] : memref<16x4xf32, #tpu.memory_space<vmem>>, vector<16x4xf32>
    tpu.vector_store %arg7[%c0_14, %c0_15], %21 {strides = array<i32>} : memref<16x4xf32, #tpu.memory_space<vmem>>, vector<16x4xf32>,
    %c0_i32_16 = arith.constant 0 : i32
    %23 = arith.cmpi eq, %arg1, %c0_i32_16 : i32
    %24 = arith.extui %23 : i1 to i32
    %c0_i32_17 = arith.constant 0 : i32
    %25 = arith.cmpi ne, %24, %c0_i32_17 : i32
    scf.if %25 {
      %c0_18 = arith.constant 0 : index
      %c0_19 = arith.constant 0 : index
      %26 = vector.load %arg7[%c0_18, %c0_19] : memref<16x4xf32, #tpu.memory_space<vmem>>, vector<16x4xf32>
      %c0_20 = arith.constant 0 : index
      %c0_21 = arith.constant 0 : index
      %27 = vector.load %arg6[%c0_20, %c0_21] : memref<1x4xf32, #tpu.memory_space<vmem>>, vector<1x4xf32>
      %28 = vector.broadcast %27 : vector<1x4xf32> to vector<16x4xf32>
      %29 = arith.addf %26, %28 : vector<16x4xf32>
      %c0_22 = arith.constant 0 : index
      %c0_23 = arith.constant 0 : index
      %30 = vector.load %arg7[%c0_22, %c0_23] : memref<16x4xf32, #tpu.memory_space<vmem>>, vector<16x4xf32>
      tpu.vector_store %arg7[%c0_22, %c0_23], %29 {strides = array<i32>} : memref<16x4xf32, #tpu.memory_space<vmem>>, vector<16x4xf32>,
    } else {
    }
    return
  }
  func.func @transform_0(%arg0: i32, %arg1: i32) -> (i32, i32) {
    %c0_i32 = arith.constant 0 : i32
    %c0_i32_0 = arith.constant 0 : i32
    return %arg0, %c0_i32 : i32, i32
  }
  func.func @transform_1(%arg0: i32, %arg1: i32) -> (i32, i32) {
    %c0_i32 = arith.constant 0 : i32
    %c0_i32_0 = arith.constant 0 : i32
    return %arg1, %c0_i32 : i32, i32
  }
  func.func @transform_2(%arg0: i32, %arg1: i32) -> (i32, i32) {
    %c0_i32 = arith.constant 0 : i32
    %c0_i32_0 = arith.constant 0 : i32
    return %c0_i32, %arg1 : i32, i32
  }
  func.func @transform_3(%arg0: i32, %arg1: i32) -> (i32, i32) {
    %c0_i32 = arith.constant 0 : i32
    %c0_i32_0 = arith.constant 0 : i32
    return %arg1, %c0_i32 : i32, i32
  }
  func.func @transform_4(%arg0: i32, %arg1: i32) -> (i32, i32) {
    %c0_i32 = arith.constant 0 : i32
    %c0_i32_0 = arith.constant 0 : i32
    %c0_i32_1 = arith.constant 0 : i32
    return %c0_i32, %c0_i32_0 : i32, i32
  }
  func.func @transform_5(%arg0: i32, %arg1: i32) -> (i32, i32) {
    %c0_i32 = arith.constant 0 : i32
    %c0_i32_0 = arith.constant 0 : i32
    return %arg0, %c0_i32 : i32, i32
  }
}

</mosaic_0001>

<bundles_post_ra>
// kernel: tpu_custom_call.1
= control target key start
LH: loop header
LB: loop body
LE: loop exit
PB: predicated region body
PF: predicated region fallthrough
CT: control target
= control target key end

     0   :  { %vm25_vm0 = vcmask 31744   ;;  %v231_v47 = vmov 0.0   ;;  %vm166_vm9 = vcmask 130048   ;;  %s333_s1 = inlined_call_operand.vmem [shape: bf16[16,4], index: 1, kind: input, shape index: {}]   ;;  %s334_s2 = inlined_call_operand.vmem [shape: f32[1,16], index: 2, kind: input, shape index: {}]   ;;  %s335_s0 = inlined_call_operand.vmem [shape: bf16[16,4], index: 0, kind: input, shape index: {}]   ;;  %s336_s4 = inlined_call_operand.vmem [shape: f32[1,4], index: 4, kind: input, shape index: {}]   ;;  %s337_s3 = inlined_call_operand.vmem [shape: bf16[16,4], index: 3, kind: input, shape index: {}]   ;;  %s338_s5 = inlined_call_operand.vmem [shape: f32[16,4], index: 5, kind: output, shape index: {}]  }
   0x1   :  { %v222_v0 = vld [vmem:[%s333_s1] sm:$0xff]  ;;  %26 = vst.msk [vmem:[%s338_s5] sm:$0xff] %vm25_vm0, %v231_v47 }
   0x2   :  { %v51_v1 = vsel %vm25_vm0, %v222_v0, 0  ;;  %v221_v2 = vld [vmem:[%s335_s0] sm:$0xff]  ;;  %27 = vst.msk [vmem:[%s338_s5 + $0x8] sm:$0xff] %vm25_vm0, %v231_v47 }
   0x3   :  { %60 = vmatpush.bf16.xpose.msra.mxu0 %v51_v1  ;;  %v225_v3 = vld [vmem:[%s334_s2] ss:$0 sm:$0xff] }
   0x4   :  { %v223_v41 = vld [vmem:[%s337_s3] sm:$0xff] }
   0x5   :  { %177 = vmatpush.bf16.msra.mxu1 %v223_v41 }
   0xa   :  { %213 = vmatmul.msk.bf16.vlgmr.msra.gmra.mxu0 %vm25_vm0, %v221_v2 }
  0x87   :  { %v62_v4 = vpop.f32.mrf.mxu0 }
  0x88   :  { %v273_v5 = vadd.f32 %v225_v3, %v62_v4 }
  0x8a   :  { %v276_v6 = vmul.f32 0.70710677, %v273_v5 }
  0x8c   :  { %v71_v7 = vmul.f32 %v276_v6, %v276_v6 }
  0x8e   :  { %v72_v8 = vmin.f32 %v71_v7, 16.0 }
  0x8f   :  { %v64_v9 = vpop.f32.mrf.mxu0 }
  0x90   :  { %v73_v10 = vmul.f32 2.1237322e-06, %v72_v8  ;;  %v84_v11 = vmul.f32 3.8918573e-05, %v72_v8  ;;  %v280_v12 = vadd.f32 %v225_v3, %v64_v9 }
  0x92   :  { %v74_v13 = vadd.f32 0.00028619796, %v73_v10  ;;  %v85_v14 = vadd.f32 0.001143296, %v84_v11  ;;  %v283_v15 = vmul.f32 0.70710677, %v280_v12 }
  0x94   :  { %v86_v16 = vmul.f32 %v85_v14, %v72_v8  ;;  %v111_v17 = vmul.f32 %v283_v15, %v283_v15  ;;  %v75_v18 = vmul.f32 %v74_v13, %v72_v8 }
  0x96   :  { %v87_v19 = vadd.f32 0.014752088, %v86_v16  ;;  %v112_v20 = vmin.f32 %v111_v17, 16.0  ;;  %v76_v24 = vadd.f32 0.0036580483, %v75_v18 }
  0x98   :  { %v88_v21 = vmul.f32 %v87_v19, %v72_v8  ;;  %v113_v22 = vmul.f32 2.1237322e-06, %v112_v20  ;;  %v124_v23 = vmul.f32 3.8918573e-05, %v112_v20  ;;  %v77_v31 = vmul.f32 %v76_v24, %v72_v8 }
  0x9a   :  { %v89_v25 = vadd.f32 0.112945676, %v88_v21  ;;  %v114_v26 = vadd.f32 0.00028619796, %v113_v22  ;;  %v125_v27 = vadd.f32 0.001143296, %v124_v23 }
  0x9b   :  { %v78_v37 = vadd.f32 0.05243302, %v77_v31  ;;  %v67_v22 = vmul.f32 0.5, %v273_v5  ;;  %v68_v23 = vmul.f32 0.5, %v280_v12  ;;  %v156_v5 = vld [vmem:[%s338_s5 + $0x8] sm:$0xff] }
  0x9c   :  { %v90_v28 = vmul.f32 %v89_v25, %v72_v8  ;;  %v115_v29 = vmul.f32 %v114_v26, %v112_v20  ;;  %v126_v30 = vmul.f32 %v125_v27, %v112_v20  ;;  %v226_v12 = vld [vmem:[%s336_s4] ss:$0 sm:$0xff] }
  0x9d   :  { %v79_v43 = vmul.f32 %v78_v37, %v72_v8 }
  0x9e   :  { %v91_v32 = vadd.f32 0.4994258, %v90_v28  ;;  %v116_v33 = vadd.f32 0.0036580483, %v115_v29  ;;  %v127_v34 = vadd.f32 0.014752088, %v126_v30 }
  0x9f   :  { %v80_v49 = vadd.f32 0.18741608, %v79_v43 }
  0xa0   :  { %v92_v35 = vmul.f32 %v91_v32, %v72_v8  ;;  %v128_v36 = vmul.f32 %v127_v34, %v112_v20  ;;  %v117_v39 = vmul.f32 %v116_v33, %v112_v20 }
  0xa1   :  { %v81_v54 = vmul.f32 %v80_v49, %v72_v8 }
  0xa2   :  { %v93_v38 = vadd.f32 1.0, %v92_v35  ;;  %v129_v40 = vadd.f32 0.112945676, %v128_v36  ;;  %v118_v44 = vadd.f32 0.05243302, %v117_v39 }
  0xa3   :  { %v82_v60 = vadd.f32 1.1283791, %v81_v54 }
  0xa4   :  { %227 = vrcp.f32 %v93_v38  ;;  %v130_v42 = vmul.f32 %v129_v40, %v112_v20  ;;  %v119_v51 = vmul.f32 %v118_v44, %v112_v20  ;;  %v105_v56 = vand.u32 2147483648, %v93_v38 }
  0xa5   :  { %v103_v58 = vand.u32 2147483647, %v93_v38  ;;  %vm99_vm2 = vweird.f32 %v93_v38  ;;  %v83_v3 = vmul.f32 %v82_v60, %v276_v6 }
  0xa6   :  { %v131_v45 = vadd.f32 0.4994258, %v130_v42  ;;  %v120_v57 = vadd.f32 0.18741608, %v119_v51  ;;  %v106_v63 = vor.u32 1.1754944e-38, %v105_v56 }
  0xa7   :  { %vm104_vm4 = vcmp.eq.f32.partialorder %v103_v58, 8.507059e+37 }
  0xa8   :  { %v132_v46 = vmul.f32 %v131_v45, %v112_v20  ;;  %v121_v0 = vmul.f32 %v120_v57, %v112_v20 }
  0xaa   :  { %v228_v48 = vpop.eup %227  ;;  %v133_v52 = vadd.f32 1.0, %v132_v46  ;;  %v122_v7 = vadd.f32 1.1283791, %v121_v0 }
  0xab   :  { %v95_v50 = vmul.f32 %v228_v48, %v93_v38  ;;  %vm100_vm1 = vweird.f32 %v228_v48 }
  0xac   :  { %229 = vrcp.f32 %v133_v52  ;;  %vm101_vm3 = vmor %vm99_vm2, %vm100_vm1  ;;  %v145_v8 = vand.u32 2147483648, %v133_v52  ;;  %v143_v11 = vand.u32 2147483647, %v133_v52  ;;  %vm139_vm6 = vweird.f32 %v133_v52 }
  0xad   :  { %v96_v53 = vsub.f32 1.0, %v95_v50  ;;  %v123_v17 = vmul.f32 %v122_v7, %v283_v15  ;;  %v155_v15 = vld [vmem:[%s338_s5] sm:$0xff] }
  0xae   :  { %v146_v14 = vor.u32 1.1754944e-38, %v145_v8  ;;  %vm144_vm8 = vcmp.eq.f32.partialorder %v143_v11, 8.507059e+37 }
  0xaf   :  { %v97_v55 = vmul.f32 %v228_v48, %v96_v53 }
  0xb1   :  { %v98_v59 = vadd.f32 %v228_v48, %v97_v55 }
  0xb2   :  { %v230_v61 = vpop.eup %229 }
  0xb3   :  { %v102_v62 = vsel %vm101_vm3, %v228_v48, %v98_v59  ;;  %v135_v1 = vmul.f32 %v230_v61, %v133_v52  ;;  %vm140_vm5 = vweird.f32 %v230_v61 }
  0xb4   :  { %v107_v2 = vsel %vm104_vm4, %v106_v63, %v102_v62  ;;  %vm141_vm7 = vmor %vm139_vm6, %vm140_vm5 }
  0xb5   :  { %v136_v4 = vsub.f32 1.0, %v135_v1  ;;  %v108_v9 = vmul.f32 %v107_v2, %v83_v3 }
  0xb7   :  { %v137_v10 = vmul.f32 %v230_v61, %v136_v4  ;;  %v214_v16 = vclamps-f32 %v108_v9, 1.0 }
  0xb9   :  { %v138_v13 = vadd.f32 %v230_v61, %v137_v10  ;;  %v151_v21 = vadd.f32 1.0, %v214_v16 }
  0xbb   :  { %v142_v18 = vsel %vm141_vm7, %v230_v61, %v138_v13  ;;  %v153_v25 = vmul.f32 %v151_v21, %v67_v22 }
  0xbc   :  { %v147_v19 = vsel %vm144_vm8, %v146_v14, %v142_v18 }
  0xbd   :  { %v148_v20 = vmul.f32 %v147_v19, %v123_v17 }
  0xbf   :  { %v215_v6 = vclamps-f32 %v148_v20, 1.0 }
  0xc1   :  { %v152_v24 = vadd.f32 1.0, %v215_v6 }
  0xc3   :  { %v154_v26 = vmul.f32 %v152_v24, %v68_v23 }
  0xc5   :  { %v157_v27 = vpack.c.bf16 %v154_v26, %v153_v25 }
  0xc7   :  { %220 = vmatmul.msk.bf16.vlgmr.msra.gmra.mxu1 %vm166_vm9, %v157_v27 }
 0x144   :  { %v179_v28 = vpop.f32.mrf.mxu1 }
 0x145   :  { %v184_v29 = vadd.f32 %v179_v28, %v155_v15 }
 0x147   :  { %186 = vst.msk [vmem:[%s338_s5] sm:$0xff] %vm25_vm0, %v184_v29 }
 0x14c   :  { %v181_v30 = vpop.f32.mrf.mxu1 }
 0x14d   :  { %v185_v31 = vadd.f32 %v181_v30, %v156_v5 }
 0x14e   :  { %v191_v32 = vld [vmem:[%s338_s5] sm:$0xff] }
 0x14f   :  { %v197_v33 = vadd.f32 %v226_v12, %v191_v32  ;;  %187 = vst.msk [vmem:[%s338_s5 + $0x8] sm:$0xff] %vm25_vm0, %v185_v31 }
 0x151   :  { %199 = vst.msk [vmem:[%s338_s5] sm:$0xff] %vm25_vm0, %v197_v33 }
 0x156   :  { %v192_v34 = vld [vmem:[%s338_s5 + $0x8] sm:$0xff] }
 0x157   :  { %v198_v35 = vadd.f32 %v226_v12, %v192_v34 }
 0x159   :  { %200 = vst.msk [vmem:[%s338_s5 + $0x8] sm:$0xff] %vm25_vm0, %v198_v35 }

</bundles_post_ra>
